<compile_context>
chip_gen: v6e
topology: v6e:2x2x1
jax: 0.10.0
libtpu: 0.0.40
codegen_flags: <defaults>
</compile_context>

<pallas_src>
import jax
import jax.numpy as jnp
from jax.experimental import pallas as pl
from jax.experimental.pallas import tpu as pltpu

INPUT_SIZE = 784
HIDDEN_SIZE = 32
NUM_CLASSES = 10


def mnist_mlp_kernel(x_ref, w1_ref, b1_ref, w2_ref, b2_ref, o_ref):
    # fc1: (TB, 784)bf16 @ (784, 32)bf16 -> f32 accumulation on the MXU.
    h = jnp.dot(x_ref[...], w1_ref[...], preferred_element_type=jnp.float32)
    # Bias add + ReLU in f32 on the VPU.
    h = jnp.maximum(h + b1_ref[...], 0.0)
    # fc2: (TB, 32)bf16 @ (32, 10)bf16 -> f32.
    out = jnp.dot(h.astype(w2_ref.dtype), w2_ref[...],
                  preferred_element_type=jnp.float32)
    o_ref[...] = (out + b2_ref[...]).astype(o_ref.dtype)


def mnist_forward(x_flat, w1, b1, w2, b2, *, block_b=1024):
    """x_flat: (B, 784) f32. Weights stored (in, out). Returns (B, 10) f32 logits."""
    B = x_flat.shape[0]

    # Tile size: multiple of 8 (sublane granularity), capped at block_b.
    # block_b=1024 keeps double-buffered bf16 x tiles (~3.1 MiB) well inside
    # even v5e's 16 MiB scoped VMEM default.
    TB = min(block_b, ((B + 7) // 8) * 8)
    TB = max(8, ((TB + 7) // 8) * 8)

    # Pad batch to a tile multiple; padded rows are sliced off afterwards.
    B_pad = pl.cdiv(B, TB) * TB
    if B_pad != B:
        x_flat = jnp.pad(x_flat, ((0, B_pad - B), (0, 0)))

    # bf16 inputs to the MXU (f32 accumulation). Cast in the wrapper so the
    # HBM copy of x that the kernel streams is already bf16.
    x_bf = x_flat.astype(jnp.bfloat16)
    w1_bf = w1.astype(jnp.bfloat16)
    w2_bf = w2.astype(jnp.bfloat16)

    grid = (B_pad // TB,)

    flops = 2 * B_pad * (INPUT_SIZE * HIDDEN_SIZE + HIDDEN_SIZE * NUM_CLASSES)
    bytes_accessed = (B_pad * INPUT_SIZE * 2          # x (bf16, read)
                      + B_pad * NUM_CLASSES * 4       # logits (f32, write)
                      + INPUT_SIZE * HIDDEN_SIZE * 2  # w1 (bf16)
                      + HIDDEN_SIZE * NUM_CLASSES * 2  # w2 (bf16)
                      + HIDDEN_SIZE * 4 + NUM_CLASSES * 4)  # biases (f32)

    out = pl.pallas_call(
        mnist_mlp_kernel,
        out_shape=jax.ShapeDtypeStruct((B_pad, NUM_CLASSES), jnp.float32),
        grid_spec=pltpu.PrefetchScalarGridSpec(
            num_scalar_prefetch=0,
            grid=grid,
            in_specs=[
                # streamed, double-buffered batch tiles of x
                pl.BlockSpec((TB, INPUT_SIZE), lambda i: (i, 0)),
                # weights/biases: full-array blocks, resident across all steps
                pl.BlockSpec((INPUT_SIZE, HIDDEN_SIZE), lambda i: (0, 0)),
                pl.BlockSpec((1, HIDDEN_SIZE), lambda i: (0, 0)),
                pl.BlockSpec((HIDDEN_SIZE, NUM_CLASSES), lambda i: (0, 0)),
                pl.BlockSpec((1, NUM_CLASSES), lambda i: (0, 0)),
            ],
            out_specs=pl.BlockSpec((TB, NUM_CLASSES), lambda i: (i, 0)),
        ),
        compiler_params=pltpu.CompilerParams(
            dimension_semantics=("parallel",),  # shard batch steps across TCs (v7x)
        ),
        cost_estimate=pl.CostEstimate(
            flops=flops, transcendentals=0, bytes_accessed=bytes_accessed),
    )(x_bf, w1_bf, b1, w2_bf, b2)

    return out[:B]


def mnist_net_forward(x, w1, b1, w2, b2):
    """Mirrors MnistNet.forward: x.view(B, -1) -> fc1 -> ReLU -> fc2."""
    x_flat = x.reshape(x.shape[0], -1)
    return mnist_forward(x_flat, w1, b1, w2, b2)


def init_params(key):
    """Matches nn.Linear's U(-1/sqrt(fan_in), +1/sqrt(fan_in)) init."""
    k1, k2, k3, k4 = jax.random.split(key, 4)
    bound1 = 1.0 / (INPUT_SIZE ** 0.5)
    bound2 = 1.0 / (HIDDEN_SIZE ** 0.5)
    # stored as (in_features, out_features) = transpose of torch's weight
    w1 = jax.random.uniform(k1, (INPUT_SIZE, HIDDEN_SIZE), jnp.float32,
                            -bound1, bound1)
    b1 = jax.random.uniform(k2, (1, HIDDEN_SIZE), jnp.float32, -bound1, bound1)
    w2 = jax.random.uniform(k3, (HIDDEN_SIZE, NUM_CLASSES), jnp.float32,
                            -bound2, bound2)
    b2 = jax.random.uniform(k4, (1, NUM_CLASSES), jnp.float32, -bound2, bound2)
    return w1, b1, w2, b2


def reference_forward(x, w1, b1, w2, b2):
    x_flat = x.reshape(x.shape[0], -1)
    h = jnp.maximum(x_flat @ w1 + b1, 0.0)
    return h @ w2 + b2


if __name__ == "__main__":
    key = jax.random.PRNGKey(0)
    kx, kx2, kp = jax.random.split(key, 3)

    w1, b1, w2, b2 = init_params(kp)

    # Images exactly as MnistNet expects them: NCHW (B, 1, 28, 28).
    x = jax.random.normal(kx, (8, 1, 28, 28), jnp.float32)
    out = jax.block_until_ready(mnist_net_forward(x, w1, b1, w2, b2))
    ref = reference_forward(x, w1, b1, w2, b2)
    assert out.shape == (8, NUM_CLASSES)
    # bf16 MXU inputs with f32 accumulation -> ~1e-2 relative error vs f32 ref.
    assert jnp.allclose(out, ref, atol=5e-2, rtol=5e-2), "mismatch vs JAX reference"

    # Ragged batch (B=13) exercises the tail-padding path.
    x2 = jax.random.normal(kx2, (13, 1, 28, 28), jnp.float32)
    out2 = jax.block_until_ready(mnist_net_forward(x2, w1, b1, w2, b2))
    ref2 = reference_forward(x2, w1, b1, w2, b2)
    assert out2.shape == (13, NUM_CLASSES)
    assert jnp.allclose(out2, ref2, atol=5e-2, rtol=5e-2), "mismatch (ragged batch)"

    print("KERNEL_OK")
</pallas_src>

<mosaic_0001>
module attributes {stable_mosaic.version = 11 : i64} {
  func.func @mnist_mlp_kernel(%arg0: i32, %arg1: memref<8x784xbf16, #tpu.memory_space<vmem>>, %arg2: memref<784x32xbf16, #tpu.memory_space<vmem>>, %arg3: memref<1x32xf32, #tpu.memory_space<vmem>>, %arg4: memref<32x10xbf16, #tpu.memory_space<vmem>>, %arg5: memref<1x10xf32, #tpu.memory_space<vmem>>, %arg6: memref<8x10xf32, #tpu.memory_space<vmem>>) attributes {dimension_semantics = [#tpu.dimension_semantics<parallel>], iteration_bounds = array<i64: 1>, scalar_prefetch = 0 : i64, scratch_operands = 0 : i64, tpu.core_type = #tpu.core_type<tc>, window_params = [{transform_indices = @transform_0, window_bounds = array<i64: 8, 784>}, {pipeline_mode = #tpu.pipeline_mode<synchronous>, transform_indices = @transform_1, window_bounds = array<i64: 784, 32>}, {pipeline_mode = #tpu.pipeline_mode<synchronous>, transform_indices = @transform_2, window_bounds = array<i64: 1, 32>}, {pipeline_mode = #tpu.pipeline_mode<synchronous>, transform_indices = @transform_3, window_bounds = array<i64: 32, 10>}, {pipeline_mode = #tpu.pipeline_mode<synchronous>, transform_indices = @transform_4, window_bounds = array<i64: 1, 10>}, {transform_indices = @transform_5, window_bounds = array<i64: 8, 10>}]} {
    %c0 = arith.constant 0 : index
    %c0_0 = arith.constant 0 : index
    %0 = vector.load %arg1[%c0, %c0_0] : memref<8x784xbf16, #tpu.memory_space<vmem>>, vector<8x784xbf16>
    %c0_1 = arith.constant 0 : index
    %c0_2 = arith.constant 0 : index
    %1 = vector.load %arg2[%c0_1, %c0_2] : memref<784x32xbf16, #tpu.memory_space<vmem>>, vector<784x32xbf16>
    %cst = arith.constant dense<0.000000e+00> : vector<8x32xf32>
    %2 = tpu.matmul %0, %1, %cst {dimension_numbers = #tpu.dot_dimension_numbers<[1], [0], [0], [1], [0, 0, 1, 1], [], []>} : vector<8x784xbf16>, vector<784x32xbf16>, vector<8x32xf32> -> vector<8x32xf32>
    %c0_3 = arith.constant 0 : index
    %c0_4 = arith.constant 0 : index
    %3 = vector.load %arg3[%c0_3, %c0_4] : memref<1x32xf32, #tpu.memory_space<vmem>>, vector<1x32xf32>
    %4 = vector.broadcast %3 : vector<1x32xf32> to vector<8x32xf32>
    %5 = arith.addf %2, %4 : vector<8x32xf32>
    %cst_5 = arith.constant 0.000000e+00 : f32
    %6 = vector.broadcast %cst_5 : f32 to vector<8x32xf32>
    %7 = arith.maximumf %5, %6 : vector<8x32xf32>
    %8 = arith.truncf %7 : vector<8x32xf32> to vector<8x32xbf16>
    %c0_6 = arith.constant 0 : index
    %c0_7 = arith.constant 0 : index
    %9 = vector.load %arg4[%c0_6, %c0_7] : memref<32x10xbf16, #tpu.memory_space<vmem>>, vector<32x10xbf16>
    %cst_8 = arith.constant dense<0.000000e+00> : vector<8x10xf32>
    %10 = tpu.matmul %8, %9, %cst_8 {dimension_numbers = #tpu.dot_dimension_numbers<[1], [0], [0], [1], [0, 0, 1, 1], [], []>} : vector<8x32xbf16>, vector<32x10xbf16>, vector<8x10xf32> -> vector<8x10xf32>
    %c0_9 = arith.constant 0 : index
    %c0_10 = arith.constant 0 : index
    %11 = vector.load %arg5[%c0_9, %c0_10] : memref<1x10xf32, #tpu.memory_space<vmem>>, vector<1x10xf32>
    %12 = vector.broadcast %11 : vector<1x10xf32> to vector<8x10xf32>
    %13 = arith.addf %10, %12 : vector<8x10xf32>
    %c0_11 = arith.constant 0 : index
    %c0_12 = arith.constant 0 : index
    %14 = vector.load %arg6[%c0_11, %c0_12] : memref<8x10xf32, #tpu.memory_space<vmem>>, vector<8x10xf32>
    tpu.vector_store %arg6[%c0_11, %c0_12], %13 {strides = array<i32>} : memref<8x10xf32, #tpu.memory_space<vmem>>, vector<8x10xf32>,
    return
  }
  func.func @transform_0(%arg0: i32) -> (i32, i32) {
    %c0_i32 = arith.constant 0 : i32
    %c0_i32_0 = arith.constant 0 : i32
    return %arg0, %c0_i32 : i32, i32
  }
  func.func @transform_1(%arg0: i32) -> (i32, i32) {
    %c0_i32 = arith.constant 0 : i32
    %c0_i32_0 = arith.constant 0 : i32
    %c0_i32_1 = arith.constant 0 : i32
    return %c0_i32, %c0_i32_0 : i32, i32
  }
  func.func @transform_2(%arg0: i32) -> (i32, i32) {
    %c0_i32 = arith.constant 0 : i32
    %c0_i32_0 = arith.constant 0 : i32
    %c0_i32_1 = arith.constant 0 : i32
    return %c0_i32, %c0_i32_0 : i32, i32
  }
  func.func @transform_3(%arg0: i32) -> (i32, i32) {
    %c0_i32 = arith.constant 0 : i32
    %c0_i32_0 = arith.constant 0 : i32
    %c0_i32_1 = arith.constant 0 : i32
    return %c0_i32, %c0_i32_0 : i32, i32
  }
  func.func @transform_4(%arg0: i32) -> (i32, i32) {
    %c0_i32 = arith.constant 0 : i32
    %c0_i32_0 = arith.constant 0 : i32
    %c0_i32_1 = arith.constant 0 : i32
    return %c0_i32, %c0_i32_0 : i32, i32
  }
  func.func @transform_5(%arg0: i32) -> (i32, i32) {
    %c0_i32 = arith.constant 0 : i32
    %c0_i32_0 = arith.constant 0 : i32
    return %arg0, %c0_i32 : i32, i32
  }
}

</mosaic_0001>

<bundles_post_ra>
// kernel: tpu_custom_call.1
= control target key start
LH: loop header
LB: loop body
LE: loop exit
PB: predicated region body
PF: predicated region fallthrough
CT: control target
= control target key end

     0   :  { %v928_v43 = vmov 0.0   ;;  %vm929_vm0 = vmmov 0   ;;  %vm449_vm1 = vcmask 130048   ;;  %s1137_s0 = inlined_call_operand.vmem [shape: bf16[8,784], index: 0, kind: input, shape index: {}]   ;;  %s1138_s1 = inlined_call_operand.vmem [shape: bf16[784,32], index: 1, kind: input, shape index: {}]   ;;  %s1139_s2 = inlined_call_operand.vmem [shape: f32[1,32], index: 2, kind: input, shape index: {}]   ;;  %s1140_s3 = inlined_call_operand.vmem [shape: bf16[32,10], index: 3, kind: input, shape index: {}]   ;;  %s1141_s4 = inlined_call_operand.vmem [shape: f32[1,10], index: 4, kind: input, shape index: {}]   ;;  %s1142_s5 = inlined_call_operand.hbm [shape: f32[8,10], index: 5, kind: output, shape index: {}]  }
   0x1   :  { %v848_v0 = vld [vmem:[%s1138_s1 + $0x78] sm:$0xff]   ;;  %v852_v4 = vld [vmem:[%s1138_s1 + $0x70] sm:$0xff]   ;;  %v856_v8 = vld [vmem:[%s1138_s1 + $0x68] sm:$0xff]  }
   0x2   :  { %v849_v1 = vld [vmem:[%s1138_s1 + $0x38] sm:$0xff]   ;;  %760 = vmatprep.subr.bf16.mxu0 %v848_v0  ;;  %v853_v5 = vld [vmem:[%s1138_s1 + $0x30] sm:$0xff]   ;;  %v857_v9 = vld [vmem:[%s1138_s1 + $0x28] sm:$0xff]  }
   0x3   :  { %v850_v2 = vld [vmem:[%s1138_s1 + $0xf8] sm:$0xff]   ;;  %761 = vmatpush3.bf16.msra.mxu0 %v849_v1  ;;  %v854_v6 = vld [vmem:[%s1138_s1 + $0xf0] sm:$0xff]   ;;  %v858_v10 = vld [vmem:[%s1138_s1 + $0xe8] sm:$0xff]  }
   0x4   :  { %v851_v3 = vld [vmem:[%s1138_s1 + $0xb8] sm:$0xff]   ;;  %782 = vmatprep.subr.bf16.mxu1 %v850_v2  ;;  %762 = vmatprep.subr.bf16.mxu0 %v852_v4  ;;  %v855_v7 = vld [vmem:[%s1138_s1 + $0xb0] sm:$0xff]   ;;  %v859_v11 = vld [vmem:[%s1138_s1 + $0xa8] sm:$0xff]  }
   0x5   :  { %783 = vmatpush3.bf16.msra.mxu1 %v851_v3  ;;  %v860_v12 = vld [vmem:[%s1138_s1 + $0x60] sm:$0xff]   ;;  %v864_v16 = vld [vmem:[%s1138_s1 + $0x58] sm:$0xff]   ;;  %v868_v20 = vld [vmem:[%s1138_s1 + $0x50] sm:$0xff]  }
   0x6   :  { %784 = vmatprep.subr.bf16.mxu1 %v854_v6  ;;  %v861_v13 = vld [vmem:[%s1138_s1 + $0x20] sm:$0xff]   ;;  %v865_v17 = vld [vmem:[%s1138_s1 + $0x18] sm:$0xff]   ;;  %v869_v21 = vld [vmem:[%s1138_s1 + $0x10] sm:$0xff]  }
   0x7   :  { %763 = vmatpush3.bf16.msra.mxu0 %v853_v5  ;;  %v862_v14 = vld [vmem:[%s1138_s1 + $0xe0] sm:$0xff]   ;;  %v866_v18 = vld [vmem:[%s1138_s1 + $0xd8] sm:$0xff]   ;;  %v870_v22 = vld [vmem:[%s1138_s1 + $0xd0] sm:$0xff]  }
   0x8   :  { %764 = vmatprep.subr.bf16.mxu0 %v856_v8  ;;  %v863_v15 = vld [vmem:[%s1138_s1 + $0xa0] sm:$0xff]   ;;  %v867_v19 = vld [vmem:[%s1138_s1 + $0x98] sm:$0xff]   ;;  %v871_v23 = vld [vmem:[%s1138_s1 + $0x90] sm:$0xff]  }
   0x9   :  { %785 = vmatpush3.bf16.msra.mxu1 %v855_v7  ;;  %v872_v24 = vld [vmem:[%s1138_s1 + $0x48] sm:$0xff]   ;;  %v876_v28 = vld [vmem:[%s1138_s1 + $0x40] sm:$0xff]   ;;  %v882_v35 = vld [vmem:[%s1138_s1 + $0x178] sm:$0xff]  }
   0xa   :  { %786 = vmatprep.subr.bf16.mxu1 %v858_v10  ;;  %v873_v25 = vld [vmem:[%s1138_s1 + $0x8] sm:$0xff]   ;;  %v877_v29 = vld [vmem:[%s1138_s1] sm:$0xff]   ;;  %v885_v39 = vld [vmem:[%s1138_s1 + $0x138] sm:$0xff]  }
   0xb   :  { %765 = vmatpush3.bf16.msra.mxu0 %v857_v9  ;;  %v874_v26 = vld [vmem:[%s1138_s1 + $0xc8] sm:$0xff]   ;;  %v878_v30 = vld [vmem:[%s1138_s1 + $0xc0] sm:$0xff]   ;;  %v886_v40 = vld [vmem:[%s1138_s1 + $0x170] sm:$0xff]  }
   0xc   :  { %766 = vmatprep.subr.bf16.mxu0 %v860_v12  ;;  %v875_v27 = vld [vmem:[%s1138_s1 + $0x88] sm:$0xff]   ;;  %v22_v31 = vld [vmem:[%s1137_s0] sm:$0xff]  ;;  %v887_v41 = vld [vmem:[%s1138_s1 + $0x130] sm:$0xff]  }
   0xd   :  { %787 = vmatpush3.bf16.msra.mxu1 %v859_v11  ;;  %v699_v32 = vcombine.low %v22_v31, %v22_v31  ;;  %v700_v33 = vcombine.high %v22_v31, %v22_v31  ;;  %v881_v34 = vld [vmem:[%s1138_s1 + $0x80] sm:$0xff]   ;;  %v23_v36 = vld [vmem:[%s1137_s0 + $0x8] sm:$0xff]  ;;  %v892_v47 = vld [vmem:[%s1138_s1 + $0x158] sm:$0xff]  }
   0xe   :  { %788 = vmatprep.subr.bf16.mxu1 %v862_v14  ;;  %v701_v37 = vcombine.low %v23_v36, %v23_v36  ;;  %v702_v38 = vcombine.high %v23_v36, %v23_v36  ;;  %v888_v42 = vld [vmem:[%s1138_s1 + $0x168] sm:$0xff]   ;;  %v890_v45 = vld [vmem:[%s1138_s1 + $0x160] sm:$0xff]   ;;  %v893_v48 = vld [vmem:[%s1138_s1 + $0x118] sm:$0xff]  }
   0xf   :  { %767 = vmatpush3.bf16.msra.mxu0 %v861_v13  ;;  %485 = vmatprep.mubr.bf16.mxu0 %v700_v33  ;;  %v889_v44 = vld [vmem:[%s1138_s1 + $0x128] sm:$0xff]   ;;  %v891_v46 = vld [vmem:[%s1138_s1 + $0x120] sm:$0xff]   ;;  %v894_v49 = vld [vmem:[%s1138_s1 + $0x150] sm:$0xff]  }
  0x10   :  { %768 = vmatprep.subr.bf16.mxu0 %v864_v16  ;;  %525 = vmatprep.mubr.bf16.mxu1 %v702_v38  ;;  %v900_v50 = vld [vmem:[%s1138_s1 + $0x180] sm:$0xff]   ;;  %v24_v51 = vld [vmem:[%s1137_s0 + $0x10] sm:$0xff]  ;;  %v903_v53 = vld [vmem:[%s1137_s0 + $0x18] ss:$0 sps:$4 sm:$0xff]  }
  0x11   :  { %789 = vmatpush3.bf16.msra.mxu1 %v863_v15  ;;  %v704_v52 = vcombine.high %v24_v51, %v24_v51  ;;  %v895_v54 = vld [vmem:[%s1138_s1 + $0x110] sm:$0xff]  }
  0x12   :  { %790 = vmatprep.subr.bf16.mxu1 %v866_v18 }
  0x13   :  { %769 = vmatpush3.bf16.msra.mxu0 %v865_v17 }
  0x14   :  { %770 = vmatprep.subr.bf16.mxu0 %v868_v20 }
  0x15   :  { %791 = vmatpush3.bf16.msra.mxu1 %v867_v19 }
  0x16   :  { %792 = vmatprep.subr.bf16.mxu1 %v870_v22 }
  0x17   :  { %771 = vmatpush3.bf16.msra.mxu0 %v869_v21 }
  0x18   :  { %772 = vmatprep.subr.bf16.mxu0 %v872_v24 }
  0x19   :  { %793 = vmatpush3.bf16.msra.mxu1 %v871_v23 }
  0x1a   :  { %794 = vmatprep.subr.bf16.mxu1 %v874_v26 }
  0x1b   :  { %773 = vmatpush3.bf16.msra.mxu0 %v873_v25 }
  0x1c   :  { %774 = vmatprep.subr.bf16.mxu0 %v876_v28 }
  0x1d   :  { %795 = vmatpush3.bf16.msra.mxu1 %v875_v27 }
  0x1e   :  { %796 = vmatprep.subr.bf16.mxu1 %v878_v30 }
  0x1f   :  { %775 = vmatpush3.bf16.msra.mxu0 %v877_v29 }
  0x20   :  { %804 = vmatprep.subr.bf16.mxu0 %v882_v35 }
  0x21   :  { %797 = vmatpush3.bf16.msra.mxu1 %v881_v34 }
  0x22   :  { %486 = vmatmul.mubr.bf16.vlgmr.msra.gmra.mxu0 %v699_v32  ;;  %831 = vmatprep.subr.bf16.mxu1 %v928_v43 }
  0x23   :  { %805 = vmatpush3.bf16.msra.mxu0 %v885_v39  ;;  %565 = vmatprep.mubr.bf16.mxu0 %v704_v52 }
  0x24   :  { %526 = vmatmul.mubr.bf16.vlgmr.msra.gmra.mxu1 %v701_v37  ;;  %806 = vmatprep.subr.bf16.mxu0 %v886_v40 }
  0x25   :  { %833 = vmatprep.mubr.msk.bf16.mxu1 %vm929_vm0, %v928_v43  ;;  %832 = vmatpush3.bf16.msra.mxu1 %v900_v50 }
  0x27   :  { %807 = vmatpush3.bf16.msra.mxu0 %v887_v41 }
  0x28   :  { %808 = vmatprep.subr.bf16.mxu0 %v888_v42 }
  0x2b   :  { %809 = vmatpush3.bf16.msra.mxu0 %v889_v44 }
  0x2c   :  { %810 = vmatprep.subr.bf16.mxu0 %v890_v45 }
  0x2f   :  { %811 = vmatpush3.bf16.msra.mxu0 %v891_v46 }
  0x30   :  { %812 = vmatprep.subr.bf16.mxu0 %v892_v47 }
  0x33   :  { %813 = vmatpush3.bf16.msra.mxu0 %v893_v48 }
  0x34   :  { %10 = vsyncpa [#allocation3], 0  ;;  %814 = vmatprep.subr.bf16.mxu0 %v894_v49  ;;  %v896_v55 = vld [vmem:[%s1138_s1 + $0x148] sm:$0xff]   ;;  %837 = vmatprep.subr.bf16.mxu1 %v928_v43  ;;  %v898_v57 = vld [vmem:[%s1138_s1 + $0x140] sm:$0xff]   ;;  %v703_v59 = vcombine.low %v24_v51, %v24_v51  ;;  %vm638_vm2 = vcmask 261120   ;;  %s930_s29 = smov [#allocation2]  }
  0x35   :  { %834 = vmatmul.mubr.msk.bf16.vlgmr.msra.gmra.mxu1 %vm449_vm1, %v903_v53  ;;  %v897_v56 = vld [vmem:[%s1138_s1 + $0x108] sm:$0xff]   ;;  %v899_v58 = vld [vmem:[%s1138_s1 + $0x100] sm:$0xff]   ;;  %vm682_vm3 = vcmask 80896  }
  0x36   :  { %841 = vmatprep.mubr.msk.bf16.mxu1 %vm929_vm0, %v928_v43  ;;  %v904_v60 = vld [vmem:[%s1140_s3 + $0x8] sm:$0xff]   ;;  %v905_v61 = vld [vmem:[%s1140_s3] sm:$0xff]  }
  0x37   :  { %815 = vmatpush3.bf16.msra.mxu0 %v895_v54  ;;  %838 = vmatpush3.bf16.msra.mxu1 %v904_v60  ;;  %v698_v11 = vld [vmem:[%s1139_s2] ss:$0 sm:$0xff]  ;;  %s690_s2 = sshll.u32 %s930_s29, 4  ;;  %s691_s2 = int_to_ptr.vmem [resolvable:$true] %s690_s2 }
  0x38   :  { %816 = vmatprep.subr.bf16.mxu0 %v896_v55  ;;  %839 = vmatprep.subr.bf16.mxu1 %v928_v43  ;;  %v756_v24 = vld [vmem:[%s1141_s4] ss:$0 sm:$0xff]  ;;  %s906_s30 = scalar_lea.vmem %s691_s2, 128  ;;  %p911_p1 = scmp.lt.s32.totalorder %s691_s2, %s691_s2 }
  0x39   :  { %p907_p0 = scmp.ne.s32.totalorder %s691_s2, %s906_s30  ;;  %p912_p2 = scmp.lt.s32.totalorder %s906_s30, %s906_s30 }
  0x3b   :  { %817 = vmatpush3.bf16.msra.mxu0 %v897_v56  ;;  %840 = vmatpush3.bf16.msra.mxu1 %v905_v61  ;;  %p913_p3 = por %p912_p2, %p911_p1 }
  0x3c   :  { %818 = vmatprep.subr.bf16.mxu0 %v898_v57 }
  0x3d   :  { %p914_p4 = pnand %p913_p3, %p907_p0 }
  0x3f   :  { %819 = vmatpush3.bf16.msra.mxu0 %v899_v58 }
  0x42   :  { %566 = vmatmul.mubr.bf16.vlgmr.msra.gmra.mxu0 %v703_v59 }
  0xe2   :  { %v776_v62 = vpop.f32.mrf.mxu0 }
  0xe4   :  { %v777_v63 = vpop.f32.mrf.mxu0  ;;  %v798_v0 = vpop.f32.mrf.mxu1 }
  0xe5   :  { %v778_v10 = vadd.f32 %v777_v63, %v776_v62 }
  0xe6   :  { %v779_v1 = vpop.f32.mrf.mxu0  ;;  %v799_v2 = vpop.f32.mrf.mxu1 }
  0xe7   :  { %v488_v12 = vadd.f32 %v778_v10, %v698_v11  ;;  %v800_v13 = vadd.f32 %v799_v2, %v798_v0 }
  0xe8   :  { %v780_v3 = vpop.f32.mrf.mxu0  ;;  %v801_v4 = vpop.f32.mrf.mxu1 }
  0xe9   :  { %v528_v16 = vadd.f32 %v800_v13, %v488_v12 }
  0xea   :  { %v802_v5 = vpop.f32.mrf.mxu1 }
  0xf5   :  { %v607_v6 = vpop.f32.mrf.mxu1 }
  0xf7   :  { %v835_v7 = vpop.f32.mrf.mxu1 }
  0xf9   :  { %v610_v8 = vpop.f32.mrf.mxu1 }
  0xfb   :  { %v836_v9 = vpop.f32.mrf.mxu1 }
 0x102   :  { %v820_v14 = vpop.f32.mrf.mxu0 }
 0x104   :  { %v821_v15 = vpop.f32.mrf.mxu0 }
 0x105   :  { %v822_v17 = vadd.f32 %v821_v15, %v820_v14 }
 0x106   :  { %v823_v18 = vpop.f32.mrf.mxu0 }
 0x107   :  { %v568_v19 = vadd.f32 %v822_v17, %v528_v16 }
 0x108   :  { %v824_v20 = vpop.f32.mrf.mxu0 }
 0x109   :  { %v608_v21 = vadd.f32 %v607_v6, %v568_v19 }
 0x10b   :  { %v613_v22 = vmax.f32 %v608_v21, 0.0 }
 0x10d   :  { %v614_v23 = vpack.c.bf16 %v613_v22, %v613_v22 }
 0x10f   :  { %842 = vmatmul.mubr.msk.bf16.vlgmr.msra.gmra.mxu1 %vm638_vm2, %v614_v23 }
 0x1cf   :  { %v676_v25 = vpop.f32.mrf.mxu1 }
 0x1d0   :  { %v677_v26 = vadd.f32 %v756_v24, %v676_v25 }
 0x1d1   :  { %v843_v27 = vpop.f32.mrf.mxu1 }
 0x1d2   :  { %683 = vst.msk [vmem:[#allocation2] sm:$0xff] %vm682_vm3, %v677_v26 }
 0x1d3   :  { %v679_v28 = vpop.f32.mrf.mxu1 }
 0x1d4   :  { %917 = shalt.err (!%p914_p4)
}
 0x1d5   :  { %693 = dma.vmem_to_hbm [thread:$0]  %s691_s2, 128, %s1142_s5, [#allocation3]   ;;  %v844_v29 = vpop.f32.mrf.mxu1 }
 0x1d6   :  { %926 = dma.done.wait [#allocation3], 128  }
 0x1d7   :  { %927 = vsyncadd [#allocation3], 4294967168 }
 0x1d8   :  { %697 = vsyncpa [#allocation3], 1 }

</bundles_post_ra>
